<compile_context>
chip_gen: v5e
topology: v5e:2x2
jax: 0.10.0
libtpu: 0.0.40
codegen_flags: <defaults>
</compile_context>

<pallas_src>
import jax
import jax.numpy as jnp
from jax.experimental import pallas as pl
from jax.experimental.pallas import tpu as pltpu


def _round_up(x, m):
    return (x + m - 1) // m * m


def pooler_kernel(x_ref, w_ref, b_ref, o_ref):
    # x: (tm, Hin) bf16   w: (Hin, tn) bf16   b: (1, tn) f32   o: (tm, tn)
    acc = jnp.dot(x_ref[...], w_ref[...], preferred_element_type=jnp.float32)
    acc = acc + b_ref[...]
    o_ref[...] = jnp.tanh(acc).astype(o_ref.dtype)


def init_params(key, hidden_size):
    k_w, k_b = jax.random.split(key)
    scale = 0.02
    return {
        # nn.Linear weight stored pre-transposed as [in, out]
        "w": scale * jax.random.normal(k_w, (hidden_size, hidden_size), jnp.float32),
        "b": scale * jax.random.normal(k_b, (hidden_size,), jnp.float32),
    }


def prepare_params(params):
    """One-time: pad dense weight/bias to lane-aligned shapes and cast weight to bf16."""
    w, b = params["w"], params["b"]
    H = w.shape[0]
    Hin = _round_up(H, 128)
    Hout = _round_up(H, 128)
    w_p = jnp.pad(w, ((0, Hin - H), (0, Hout - H))).astype(jnp.bfloat16)
    b_p = jnp.pad(b, (0, Hout - H)).reshape(1, Hout).astype(jnp.float32)
    return {"w": w_p, "b": b_p, "hidden_size": H}


def albert_pooler(hidden_states, prepared, *, tm=256, tn=512):
    """hidden_states: [B, S, H] -> pooled output [B, H] = tanh(dense(first token))."""
    B, S, H = hidden_states.shape
    assert prepared["hidden_size"] == H
    w_p, b_p = prepared["w"], prepared["b"]
    Hin, Hout = w_p.shape

    # Tile sizes: rows multiple of 16 (bf16 sublane packing), columns divide Hout.
    tm = min(tm, _round_up(B, 16))
    Bp = _round_up(B, tm)
    tn = next(t for t in (tn, 512, 256, 128) if Hout % t == 0)

    # First-token selection (layout only) + small activation pad / bf16 cast.
    # TODO(synk): fuse the [:, 0] gather into the kernel via a squeezed seq BlockSpec.
    x = hidden_states[:, 0, :]                                  # [B, H]
    x_p = jnp.pad(x, ((0, Bp - B), (0, Hin - H))).astype(jnp.bfloat16)

    # Column tiles OUTER, row tiles INNER => the weight tile is fetched once
    # per column tile (constant across the inner axis) => whole weight read once.
    grid = (Hout // tn, Bp // tm)
    n_col_tiles = grid[0]

    out_dtype = hidden_states.dtype
    out_elt = jnp.dtype(out_dtype).itemsize

    # Double-buffered working set + headroom; safe on v5e defaults and v7x's 64 MiB.
    tile_bytes = 2 * (tm * Hin * 2 + Hin * tn * 2 + tn * 4 + tm * tn * out_elt)
    vmem_limit = int(min(max(tile_bytes + (8 << 20), 32 << 20), 48 << 20))

    cost = pl.CostEstimate(
        flops=2 * B * H * H,
        transcendentals=B * H,
        bytes_accessed=int(
            Hin * Hout * 2                 # bf16 weight, streamed exactly once
            + Bp * Hin * 2 * n_col_tiles   # bf16 activations, re-read per column tile
            + Hout * 4                     # bias
            + Bp * Hout * out_elt          # output write
        ),
    )

    out = pl.pallas_call(
        pooler_kernel,
        out_shape=jax.ShapeDtypeStruct((Bp, Hout), out_dtype),
        grid_spec=pltpu.PrefetchScalarGridSpec(
            num_scalar_prefetch=0,
            grid=grid,
            in_specs=[
                pl.BlockSpec((tm, Hin), lambda j, i: (i, 0)),   # activations (inner axis)
                pl.BlockSpec((Hin, tn), lambda j, i: (0, j)),   # weight (outer axis only)
                pl.BlockSpec((1, tn), lambda j, i: (0, j)),     # bias (outer axis only)
            ],
            out_specs=pl.BlockSpec((tm, tn), lambda j, i: (i, j)),
        ),
        compiler_params=pltpu.CompilerParams(
            dimension_semantics=("parallel", "parallel"),
            vmem_limit_bytes=vmem_limit,
        ),
        cost_estimate=cost,
    )(x_p, w_p, b_p)

    return out[:B, :H]


def reference_forward(hidden_states, p):
    """Pure-JAX f32 reference with identical math (first token -> Linear -> tanh)."""
    first = hidden_states[:, 0, :]
    return jnp.tanh(first @ p["w"] + p["b"])


if __name__ == "__main__":
    key = jax.random.PRNGKey(0)
    k_x, k_p = jax.random.split(key)

    B, S, H = 2, 8, 32
    hidden_states = jax.random.normal(k_x, (B, S, H), jnp.float32)
    params = init_params(k_p, H)
    prepared = prepare_params(params)   # one-time weight pad + bf16 cast

    pooled = albert_pooler(hidden_states, prepared)
    jax.block_until_ready(pooled)

    ref = reference_forward(hidden_states, params)
    assert pooled.shape == (B, H), f"bad output shape {pooled.shape}"
    # bf16 weights/activations with f32 accumulation -> loosened tolerance.
    assert jnp.allclose(pooled, ref, atol=2e-2, rtol=2e-2), "mismatch vs reference"

    print("KERNEL_OK")
</pallas_src>

<mosaic_0001>
module attributes {stable_mosaic.version = 11 : i64} {
  func.func @pooler_kernel(%arg0: i32, %arg1: i32, %arg2: memref<16x128xbf16, #tpu.memory_space<vmem>>, %arg3: memref<128x128xbf16, #tpu.memory_space<vmem>>, %arg4: memref<1x128xf32, #tpu.memory_space<vmem>>, %arg5: memref<16x128xf32, #tpu.memory_space<vmem>>) attributes {dimension_semantics = [#tpu.dimension_semantics<parallel>, #tpu.dimension_semantics<parallel>], iteration_bounds = array<i64: 1, 1>, scalar_prefetch = 0 : i64, scratch_operands = 0 : i64, tpu.core_type = #tpu.core_type<tc>, window_params = [{transform_indices = @transform_0, window_bounds = array<i64: 16, 128>}, {transform_indices = @transform_1, window_bounds = array<i64: 128, 128>}, {transform_indices = @transform_2, window_bounds = array<i64: 1, 128>}, {transform_indices = @transform_3, window_bounds = array<i64: 16, 128>}]} {
    %c0 = arith.constant 0 : index
    %c0_0 = arith.constant 0 : index
    %0 = vector.load %arg2[%c0, %c0_0] : memref<16x128xbf16, #tpu.memory_space<vmem>>, vector<16x128xbf16>
    %c0_1 = arith.constant 0 : index
    %c0_2 = arith.constant 0 : index
    %1 = vector.load %arg3[%c0_1, %c0_2] : memref<128x128xbf16, #tpu.memory_space<vmem>>, vector<128x128xbf16>
    %cst = arith.constant dense<0.000000e+00> : vector<16x128xf32>
    %2 = tpu.matmul %0, %1, %cst {dimension_numbers = #tpu.dot_dimension_numbers<[1], [0], [0], [1], [0, 0, 1, 1], [], []>} : vector<16x128xbf16>, vector<128x128xbf16>, vector<16x128xf32> -> vector<16x128xf32>
    %c0_3 = arith.constant 0 : index
    %c0_4 = arith.constant 0 : index
    %3 = vector.load %arg4[%c0_3, %c0_4] : memref<1x128xf32, #tpu.memory_space<vmem>>, vector<1x128xf32>
    %4 = vector.broadcast %3 : vector<1x128xf32> to vector<16x128xf32>
    %5 = arith.addf %2, %4 : vector<16x128xf32>
    %6 = math.tanh %5 : vector<16x128xf32>
    %c0_5 = arith.constant 0 : index
    %c0_6 = arith.constant 0 : index
    %7 = vector.load %arg5[%c0_5, %c0_6] : memref<16x128xf32, #tpu.memory_space<vmem>>, vector<16x128xf32>
    tpu.vector_store %arg5[%c0_5, %c0_6], %6 {strides = array<i32>} : memref<16x128xf32, #tpu.memory_space<vmem>>, vector<16x128xf32>,
    return
  }
  func.func @transform_0(%arg0: i32, %arg1: i32) -> (i32, i32) {
    %c0_i32 = arith.constant 0 : i32
    %c0_i32_0 = arith.constant 0 : i32
    return %arg1, %c0_i32 : i32, i32
  }
  func.func @transform_1(%arg0: i32, %arg1: i32) -> (i32, i32) {
    %c0_i32 = arith.constant 0 : i32
    %c0_i32_0 = arith.constant 0 : i32
    return %c0_i32, %arg0 : i32, i32
  }
  func.func @transform_2(%arg0: i32, %arg1: i32) -> (i32, i32) {
    %c0_i32 = arith.constant 0 : i32
    %c0_i32_0 = arith.constant 0 : i32
    return %c0_i32, %arg0 : i32, i32
  }
  func.func @transform_3(%arg0: i32, %arg1: i32) -> (i32, i32) {
    %c0_i32 = arith.constant 0 : i32
    return %arg1, %arg0 : i32, i32
  }
}

</mosaic_0001>

<bundles_post_ra>
// kernel: tpu_custom_call.1
= control target key start
LH: loop header
LB: loop body
LE: loop exit
PB: predicated region body
PF: predicated region fallthrough
CT: control target
= control target key end

     0   :  { %8 = vsyncpa [#allocation3], 0  ;;  %s335_s0 = inlined_call_operand.hbm [shape: bf16[16,128], index: 0, kind: input, shape index: {}]   ;;  %s336_s1 = inlined_call_operand.hbm [shape: bf16[128,128], index: 1, kind: input, shape index: {}]   ;;  %s337_s2 = inlined_call_operand.vmem [shape: f32[1,128], index: 2, kind: input, shape index: {}]   ;;  %s338_s3 = inlined_call_operand.hbm [shape: f32[16,128], index: 3, kind: output, shape index: {}]  }
   0x1   :  { %9 = vsyncpa [#allocation6], 0 }
   0x2   :  { %10 = vsyncpa [#allocation4], 0  ;;  %s15_s14 = sshll.u32 %s335_s0, 4  ;;  %s296_s15 = smov [#allocation2]   ;;  %s16_s14 = int_to_ptr.hbm [resolvable:$true] %s15_s14 }
   0x3   :  { %s17_s16 = sshll.u32 %s296_s15, 4  ;;  %s28_s19 = sshll.u32 %s336_s1, 4  ;;  %s18_s16 = int_to_ptr.vmem [resolvable:$true] %s17_s16  ;;  %s29_s19 = int_to_ptr.hbm [resolvable:$true] %s28_s19 }
   0x4   :  { %s297_s20 = smov 64   ;;  %s298_s21 = smov 4  }
   0x5   :  { %23 = dma.hbm_to_vmem [thread:$0]  %s16_s14, 128, %s18_s16, [#allocation3], %s297_s20, %s297_s20, %s298_s21  }
   0x6   :  { %s299_s22 = smov [#allocation5]  }
   0x7   :  { %s30_s23 = sshll.u32 %s299_s22, 4  ;;  %s31_s23 = int_to_ptr.vmem [resolvable:$true] %s30_s23 }
   0x8   :  { %36 = dma.hbm_to_vmem [thread:$0]  %s29_s19, 1024, %s31_s23, [#allocation6], %s297_s20, %s297_s20, %s298_s21  }
   0x9   :  { %290 = dma.done.wait [#allocation3], 128  }
   0xa   :  { %291 = vsyncadd [#allocation3], 4294967168 }
   0xb   :  { %292 = dma.done.wait [#allocation6], 1024  }
   0xc   :  { %293 = vsyncadd [#allocation6], 4294966272  ;;  %v205_v0 = vld [vmem:[#allocation5 + $0x38] sm:$0xff]  ;;  %v204_v1 = vld [vmem:[#allocation5 + $0x30] sm:$0xff]  ;;  %s300_s24 = smov [#allocation7]   ;;  %s147_s28 = sshll.u32 %s338_s3, 4  ;;  %s148_s28 = int_to_ptr.hbm [resolvable:$true] %s147_s28 }
   0xd   :  { %123 = vmatpush.bf16.msra.mxu0 %v205_v0  ;;  %v203_v2 = vld [vmem:[#allocation5 + $0x28] sm:$0xff]  ;;  %v202_v3 = vld [vmem:[#allocation5 + $0x20] sm:$0xff]  ;;  %v201_v4 = vld [vmem:[#allocation5 + $0x18] sm:$0xff]  ;;  %s145_s25 = sshll.u32 %s300_s24, 4  ;;  %s301_s29 = smov 128   ;;  %s146_s25 = int_to_ptr.vmem [resolvable:$true] %s145_s25 }
   0xe   :  { %v200_v5 = vld [vmem:[#allocation5 + $0x10] sm:$0xff]  ;;  %v199_v6 = vld [vmem:[#allocation5 + $0x8] sm:$0xff]  ;;  %v198_v7 = vld [vmem:[#allocation5] sm:$0xff] }
   0xf   :  { %v197_v8 = vld [vmem:[#allocation2] sm:$0xff] }
  0x10   :  { %v213_v9 = vld [vmem:[%s337_s2] ss:$0 sm:$0xff]  ;;  %s302_s2 = smov 8  }
  0x11   :  { %124 = vmatpush.bf16.msra.mxu0 %v204_v1 }
  0x15   :  { %125 = vmatpush.bf16.msra.mxu0 %v203_v2 }
  0x19   :  { %126 = vmatpush.bf16.msra.mxu0 %v202_v3 }
  0x1d   :  { %127 = vmatpush.bf16.msra.mxu0 %v201_v4 }
  0x21   :  { %128 = vmatpush.bf16.msra.mxu0 %v200_v5 }
  0x25   :  { %129 = vmatpush.bf16.msra.mxu0 %v199_v6 }
  0x29   :  { %130 = vmatpush.bf16.msra.mxu0 %v198_v7 }
  0x2c   :  { %131 = vmatmul.bf16.vlgmr.msra.gmra.mxu0 %v197_v8 }
  0xa9   :  { %v132_v10 = vpop.f32.mrf.mxu0 }
  0xaa   :  { %v133_v11 = vadd.f32 %v213_v9, %v132_v10 }
  0xac   :  { %214 = vtanh.f32 %v133_v11 }
  0xb1   :  { %v134_v12 = vpop.f32.mrf.mxu0 }
  0xb2   :  { %v215_v13 = vpop.eup %214  ;;  %v135_v14 = vadd.f32 %v213_v9, %v134_v12 }
  0xb3   :  { %139 = vst [vmem:[#allocation7] sm:$0xff] %v215_v13 }
  0xb4   :  { %216 = vtanh.f32 %v135_v14 }
  0xba   :  { %v217_v15 = vpop.eup %216 }
  0xbb   :  { %140 = vst [vmem:[#allocation7 + $0x8] sm:$0xff] %v217_v15 }
  0xbc   :  { %153 = dma.vmem_to_hbm [thread:$0]  %s146_s25, 256, %s148_s28, [#allocation4], %s301_s29, %s301_s29, %s302_s2  }
  0xbd   :  { %294 = dma.done.wait [#allocation4], 256  }
  0xbe   :  { %295 = vsyncadd [#allocation4], 4294967040 }
  0xbf   :  { %158 = vsyncpa [#allocation3], 1 }
  0xc0   :  { %159 = vsyncpa [#allocation6], 1 }
  0xc1   :  { %160 = vsyncpa [#allocation4], 1 }

</bundles_post_ra>
